<compile_context>
chip_gen: v7x
topology: tpu7x:2x2x1
jax: 0.10.0
libtpu: 0.0.40
codegen_flags: <defaults>
</compile_context>

<pallas_src>
import jax
import jax.numpy as jnp
from jax.experimental import pallas as pl
from jax.experimental.pallas import tpu as pltpu

NUM_GROUPS = 2
LANE = 128


def _round_up(n, m):
    return ((n + m - 1) // m) * m


def two_layer_kernel(x_ref, d_ref, wphi_ref, bphi_ref, wh_ref, bh_ref, out_ref):
    # phi = relu(x @ W_phi^T + b_phi): bf16 operands -> MXU, f32 accumulation.
    h = jnp.dot(x_ref[...], wphi_ref[...], preferred_element_type=jnp.float32)
    h = jnp.maximum(h + bphi_ref[...], 0.0)                 # f32 VPU (v5e-safe)

    # One fused head matmul: [bt, 3*Cp] = [ joint | group0 | group1 ].
    heads = jnp.dot(h.astype(wh_ref.dtype), wh_ref[...],
                    preferred_element_type=jnp.float32) + bh_ref[...]
    cp = heads.shape[1] // 3                                # 128-aligned slices
    joint = heads[:, :cp]
    p0 = heads[:, cp:2 * cp]
    p1 = heads[:, 2 * cp:]

    # Per-row group select replaces the torch per-sample loop (NUM_GROUPS = 2).
    d = d_ref[:, 0:1]          # protected-group id
    da = d_ref[:, 1:2]         # Bernoulli(ratio) group draw (hoisted to wrapper)
    spec = jnp.where(d == 1, p1, p0)
    agn = jnp.where(da == 1, p1, p0)

    # Single packed, lane-dense store: [ joint | specific | agnostic ].
    out_ref[...] = jnp.concatenate([joint, spec, agn], axis=1).astype(out_ref.dtype)


def two_layer_nn_forward(x, d, d_agnostic, params, *, b_tile=1024,
                         vmem_limit_bytes=48 * 1024 * 1024):
    """x: [B, F] f32.  d, d_agnostic: [B] int32 group ids in {0, 1}.
    params: PyTorch-convention weights ([out, in]) and biases ([out])."""
    w_phi, b_phi = params["w_phi"], params["b_phi"]            # [H, F], [H]
    w_joint, b_joint = params["w_joint"], params["b_joint"]    # [C, H], [C]
    w_g0, b_g0 = params["w_g0"], params["b_g0"]                # [C, H], [C]
    w_g1, b_g1 = params["w_g1"], params["b_g1"]                # [C, H], [C]

    B, F = x.shape
    H = w_phi.shape[0]
    C = w_joint.shape[0]

    Hp = _round_up(H, LANE)
    Cp = _round_up(C, LANE)
    Cp3 = 3 * Cp

    # Weights pre-transposed to [in, out] (XLA fuses the transpose with the pad)
    # and lane-padded; heads fused along the out-dim as [ joint | g0 | g1 ].
    def pad_t(w, rows, cols):          # [out, in] -> padded [in(rows), out(cols)]
        wt = w.T
        return jnp.pad(wt, ((0, rows - wt.shape[0]), (0, cols - wt.shape[1])))

    wphi_t = pad_t(w_phi, F, Hp).astype(jnp.bfloat16)               # [F, Hp]
    bphi_p = jnp.pad(b_phi.reshape(1, H), ((0, 0), (0, Hp - H)))    # [1, Hp] f32

    wh_t = jnp.concatenate(
        [pad_t(w_joint, Hp, Cp), pad_t(w_g0, Hp, Cp), pad_t(w_g1, Hp, Cp)],
        axis=1).astype(jnp.bfloat16)                                # [Hp, 3Cp]

    def pad_b(b):
        return jnp.pad(b.reshape(1, C), ((0, 0), (0, Cp - C)))

    bh_p = jnp.concatenate([pad_b(b_joint), pad_b(b_g0), pad_b(b_g1)],
                           axis=1)                                  # [1, 3Cp] f32

    # --- VMEM-aware batch tile ------------------------------------------------
    # Double-buffered x / id / packed-output streams + single-buffered weights
    # + live f32 temporaries must fit comfortably under vmem_limit_bytes.
    budget = int(0.75 * vmem_limit_bytes)
    weight_bytes = 2 * (F * Hp + Hp * Cp3) + 4 * (Hp + Cp3)
    per_row = 2 * (2 * F + 4 * LANE + 2 * Cp3) + 4 * (Hp + 2 * Cp3)
    cap = max(8, ((budget - weight_bytes) // per_row) // 8 * 8)

    B8 = _round_up(B, 8)
    bt = max(8, (min(b_tile, cap, B8) // 8) * 8)
    if bt >= B8 and B8 >= 16:
        # >= 2 grid steps so "parallel" semantics can use both v7x TensorCores.
        bt = _round_up(B8, 16) // 2
    Bp = _round_up(B, bt)
    grid = (Bp // bt,)

    xp = jnp.pad(x, ((0, Bp - B), (0, 0))).astype(jnp.bfloat16)     # [Bp, F]
    dd = jnp.stack([d.astype(jnp.int32), d_agnostic.astype(jnp.int32)], axis=1)
    dd = jnp.pad(dd, ((0, Bp - B), (0, 0)))                         # [Bp, 2]

    def row_spec(shape):               # tiled along the batch grid axis
        return pl.BlockSpec(shape, lambda i: (i, 0))

    def resident_spec(shape):          # constant block index -> single buffer
        return pl.BlockSpec(shape, lambda i: (0, 0),
                            pipeline_mode=pl.Buffered(buffer_count=1))

    flops = 2 * Bp * Hp * (F + Cp3)
    bytes_accessed = (xp.size * 2 + dd.size * 4 + wphi_t.size * 2
                      + bphi_p.size * 4 + wh_t.size * 2 + bh_p.size * 4
                      + Bp * Cp3 * 2)

    out_p = pl.pallas_call(
        two_layer_kernel,
        out_shape=jax.ShapeDtypeStruct((Bp, Cp3), jnp.bfloat16),
        grid=grid,
        in_specs=[
            row_spec((bt, F)),          # x (bf16)
            row_spec((bt, 2)),          # [D, random group draw] (int32)
            resident_spec((F, Hp)),     # W_phi^T (bf16)
            resident_spec((1, Hp)),     # b_phi (f32)
            resident_spec((Hp, Cp3)),   # [W_joint | W_g0 | W_g1]^T (bf16)
            resident_spec((1, Cp3)),    # [b_joint | b_g0 | b_g1] (f32)
        ],
        out_specs=row_spec((bt, Cp3)),
        compiler_params=pltpu.CompilerParams(
            dimension_semantics=("parallel",),
            vmem_limit_bytes=vmem_limit_bytes),
        cost_estimate=pl.CostEstimate(
            flops=flops, transcendentals=0, bytes_accessed=bytes_accessed),
    )(xp, dd, wphi_t, bphi_p, wh_t, bh_p)

    # Split the packed output / strip padding (glue only); upcast bf16 -> f32.
    joint = out_p[:B, 0:C].astype(jnp.float32)
    spec = out_p[:B, Cp:Cp + C].astype(jnp.float32)
    agn = out_p[:B, 2 * Cp:2 * Cp + C].astype(jnp.float32)
    return joint, spec, agn


if __name__ == "__main__":
    # Small shapes consistent with the module: batch=8, in_features=16,
    # hidden_size=32, nb_classes=4, ratio=0.3.
    B, F, H, C = 8, 16, 32, 4
    ratio = 0.3

    key = jax.random.PRNGKey(0)
    ks = jax.random.split(key, 11)

    x = jax.random.normal(ks[0], (B, F), dtype=jnp.float32)
    D = jax.random.bernoulli(ks[1], 0.5, (B,)).astype(jnp.int32)
    # Torch draws `1 if random.random() < ratio else 0` per row inside forward;
    # here the same Bernoulli(ratio) draw is made explicitly for determinism.
    # TODO(synk): plumb a jax.random key into the wrapper if the draw must
    # happen inside the forward itself.
    D_agn = jax.random.bernoulli(ks[2], ratio, (B,)).astype(jnp.int32)

    def lin_init(kw, kb, out_dim, in_dim):   # torch.nn.Linear-like init
        bound = 1.0 / (in_dim ** 0.5)
        w = jax.random.uniform(kw, (out_dim, in_dim), jnp.float32, -bound, bound)
        b = jax.random.uniform(kb, (out_dim,), jnp.float32, -bound, bound)
        return w, b

    w_phi, b_phi = lin_init(ks[3], ks[4], H, F)
    w_joint, b_joint = lin_init(ks[5], ks[6], C, H)
    w_g0, b_g0 = lin_init(ks[7], ks[8], C, H)
    w_g1, b_g1 = lin_init(ks[9], ks[10], C, H)

    params = dict(w_phi=w_phi, b_phi=b_phi, w_joint=w_joint, b_joint=b_joint,
                  w_g0=w_g0, b_g0=b_g0, w_g1=w_g1, b_g1=b_g1)

    joint, spec, agn = jax.block_until_ready(
        two_layer_nn_forward(x, D, D_agn, params))

    # Pure-JAX f32 reference of the torch forward (pretrained=None).
    phi = jnp.maximum(x @ w_phi.T + b_phi, 0.0)
    joint_ref = phi @ w_joint.T + b_joint
    p0 = phi @ w_g0.T + b_g0
    p1 = phi @ w_g1.T + b_g1
    spec_ref = jnp.where(D[:, None] == 1, p1, p0)
    agn_ref = jnp.where(D_agn[:, None] == 1, p1, p0)

    assert joint.shape == (B, C) and spec.shape == (B, C) and agn.shape == (B, C)
    # bf16 MXU operands + bf16 writeback vs. the f32 torch reference -> the
    # 1e-5 tolerance of the f32 version is loosened (per review).
    tol = dict(atol=5e-2, rtol=5e-2)
    assert jnp.allclose(joint, joint_ref, **tol)
    assert jnp.allclose(spec, spec_ref, **tol)
    assert jnp.allclose(agn, agn_ref, **tol)

    print("KERNEL_OK")
</pallas_src>

<mosaic_0001>
module attributes {stable_mosaic.version = 11 : i64} {
  func.func @two_layer_kernel(%arg0: i32, %arg1: memref<8x16xbf16, #tpu.memory_space<vmem>>, %arg2: memref<8x2xi32, #tpu.memory_space<vmem>>, %arg3: memref<16x128xbf16, #tpu.memory_space<vmem>>, %arg4: memref<1x128xf32, #tpu.memory_space<vmem>>, %arg5: memref<128x384xbf16, #tpu.memory_space<vmem>>, %arg6: memref<1x384xf32, #tpu.memory_space<vmem>>, %arg7: memref<8x384xbf16, #tpu.memory_space<vmem>>) attributes {dimension_semantics = [#tpu.dimension_semantics<parallel>], iteration_bounds = array<i64: 1>, scalar_prefetch = 0 : i64, scratch_operands = 0 : i64, tpu.core_type = #tpu.core_type<tc>, window_params = [{transform_indices = @transform_0, window_bounds = array<i64: 8, 16>}, {transform_indices = @transform_1, window_bounds = array<i64: 8, 2>}, {pipeline_mode = #tpu.pipeline_mode<synchronous>, transform_indices = @transform_2, window_bounds = array<i64: 16, 128>}, {pipeline_mode = #tpu.pipeline_mode<synchronous>, transform_indices = @transform_3, window_bounds = array<i64: 1, 128>}, {pipeline_mode = #tpu.pipeline_mode<synchronous>, transform_indices = @transform_4, window_bounds = array<i64: 128, 384>}, {pipeline_mode = #tpu.pipeline_mode<synchronous>, transform_indices = @transform_5, window_bounds = array<i64: 1, 384>}, {transform_indices = @transform_6, window_bounds = array<i64: 8, 384>}]} {
    %c0 = arith.constant 0 : index
    %c0_0 = arith.constant 0 : index
    %0 = vector.load %arg1[%c0, %c0_0] : memref<8x16xbf16, #tpu.memory_space<vmem>>, vector<8x16xbf16>
    %c0_1 = arith.constant 0 : index
    %c0_2 = arith.constant 0 : index
    %1 = vector.load %arg3[%c0_1, %c0_2] : memref<16x128xbf16, #tpu.memory_space<vmem>>, vector<16x128xbf16>
    %cst = arith.constant dense<0.000000e+00> : vector<8x128xf32>
    %2 = tpu.matmul %0, %1, %cst {dimension_numbers = #tpu.dot_dimension_numbers<[1], [0], [0], [1], [0, 0, 1, 1], [], []>} : vector<8x16xbf16>, vector<16x128xbf16>, vector<8x128xf32> -> vector<8x128xf32>
    %c0_3 = arith.constant 0 : index
    %c0_4 = arith.constant 0 : index
    %3 = vector.load %arg4[%c0_3, %c0_4] : memref<1x128xf32, #tpu.memory_space<vmem>>, vector<1x128xf32>
    %4 = vector.broadcast %3 : vector<1x128xf32> to vector<8x128xf32>
    %5 = arith.addf %2, %4 : vector<8x128xf32>
    %cst_5 = arith.constant 0.000000e+00 : f32
    %6 = vector.broadcast %cst_5 : f32 to vector<8x128xf32>
    %7 = arith.maximumf %5, %6 : vector<8x128xf32>
    %8 = arith.truncf %7 : vector<8x128xf32> to vector<8x128xbf16>
    %c0_6 = arith.constant 0 : index
    %c0_7 = arith.constant 0 : index
    %9 = vector.load %arg5[%c0_6, %c0_7] : memref<128x384xbf16, #tpu.memory_space<vmem>>, vector<128x384xbf16>
    %cst_8 = arith.constant dense<0.000000e+00> : vector<8x384xf32>
    %10 = tpu.matmul %8, %9, %cst_8 {dimension_numbers = #tpu.dot_dimension_numbers<[1], [0], [0], [1], [0, 0, 1, 1], [], []>} : vector<8x128xbf16>, vector<128x384xbf16>, vector<8x384xf32> -> vector<8x384xf32>
    %c0_9 = arith.constant 0 : index
    %c0_10 = arith.constant 0 : index
    %11 = vector.load %arg6[%c0_9, %c0_10] : memref<1x384xf32, #tpu.memory_space<vmem>>, vector<1x384xf32>
    %12 = vector.broadcast %11 : vector<1x384xf32> to vector<8x384xf32>
    %13 = arith.addf %10, %12 : vector<8x384xf32>
    %14 = vector.extract_strided_slice %13 {offsets = [0, 0], sizes = [8, 128], strides = [1, 1]} : vector<8x384xf32> to vector<8x128xf32>
    %15 = vector.extract_strided_slice %13 {offsets = [0, 128], sizes = [8, 128], strides = [1, 1]} : vector<8x384xf32> to vector<8x128xf32>
    %16 = vector.extract_strided_slice %13 {offsets = [0, 256], sizes = [8, 128], strides = [1, 1]} : vector<8x384xf32> to vector<8x128xf32>
    %c0_11 = arith.constant 0 : index
    %c0_12 = arith.constant 0 : index
    %17 = vector.load %arg2[%c0_11, %c0_12] : memref<8x2xi32, #tpu.memory_space<vmem>>, vector<8x1xi32>
    %c0_13 = arith.constant 0 : index
    %c1 = arith.constant 1 : index
    %18 = vector.load %arg2[%c0_13, %c1] : memref<8x2xi32, #tpu.memory_space<vmem>>, vector<8x1xi32>
    %c1_i32 = arith.constant 1 : i32
    %19 = vector.broadcast %c1_i32 : i32 to vector<8x1xi32>
    %20 = arith.cmpi eq, %17, %19 : vector<8x1xi32>
    %21 = vector.shape_cast %20 : vector<8x1xi1> to vector<8x1xi1>
    %22 = vector.broadcast %21 : vector<8x1xi1> to vector<8x128xi1>
    %23 = arith.select %22, %16, %15 : vector<8x128xi1>, vector<8x128xf32>
    %c1_i32_14 = arith.constant 1 : i32
    %24 = vector.broadcast %c1_i32_14 : i32 to vector<8x1xi32>
    %25 = arith.cmpi eq, %18, %24 : vector<8x1xi32>
    %26 = vector.shape_cast %25 : vector<8x1xi1> to vector<8x1xi1>
    %27 = vector.broadcast %26 : vector<8x1xi1> to vector<8x128xi1>
    %28 = arith.select %27, %16, %15 : vector<8x128xi1>, vector<8x128xf32>
    %29 = tpu.concatenate %14, %23, %28 in 1 : vector<8x128xf32>, vector<8x128xf32>, vector<8x128xf32> -> vector<8x384xf32>
    %30 = arith.truncf %29 : vector<8x384xf32> to vector<8x384xbf16>
    %c0_15 = arith.constant 0 : index
    %c0_16 = arith.constant 0 : index
    %31 = vector.load %arg7[%c0_15, %c0_16] : memref<8x384xbf16, #tpu.memory_space<vmem>>, vector<8x384xbf16>
    tpu.vector_store %arg7[%c0_15, %c0_16], %30 {strides = array<i32>} : memref<8x384xbf16, #tpu.memory_space<vmem>>, vector<8x384xbf16>,
    return
  }
  func.func @transform_0(%arg0: i32) -> (i32, i32) {
    %c0_i32 = arith.constant 0 : i32
    %c0_i32_0 = arith.constant 0 : i32
    return %arg0, %c0_i32 : i32, i32
  }
  func.func @transform_1(%arg0: i32) -> (i32, i32) {
    %c0_i32 = arith.constant 0 : i32
    %c0_i32_0 = arith.constant 0 : i32
    return %arg0, %c0_i32 : i32, i32
  }
  func.func @transform_2(%arg0: i32) -> (i32, i32) {
    %c0_i32 = arith.constant 0 : i32
    %c0_i32_0 = arith.constant 0 : i32
    %c0_i32_1 = arith.constant 0 : i32
    return %c0_i32, %c0_i32_0 : i32, i32
  }
  func.func @transform_3(%arg0: i32) -> (i32, i32) {
    %c0_i32 = arith.constant 0 : i32
    %c0_i32_0 = arith.constant 0 : i32
    %c0_i32_1 = arith.constant 0 : i32
    return %c0_i32, %c0_i32_0 : i32, i32
  }
  func.func @transform_4(%arg0: i32) -> (i32, i32) {
    %c0_i32 = arith.constant 0 : i32
    %c0_i32_0 = arith.constant 0 : i32
    %c0_i32_1 = arith.constant 0 : i32
    return %c0_i32, %c0_i32_0 : i32, i32
  }
  func.func @transform_5(%arg0: i32) -> (i32, i32) {
    %c0_i32 = arith.constant 0 : i32
    %c0_i32_0 = arith.constant 0 : i32
    %c0_i32_1 = arith.constant 0 : i32
    return %c0_i32, %c0_i32_0 : i32, i32
  }
  func.func @transform_6(%arg0: i32) -> (i32, i32) {
    %c0_i32 = arith.constant 0 : i32
    %c0_i32_0 = arith.constant 0 : i32
    return %arg0, %c0_i32 : i32, i32
  }
}

</mosaic_0001>

<bundles_post_ra>
// kernel: tpu_custom_call.1
= control target key start
LH: loop header
LB: loop body
LE: loop exit
PB: predicated region body
PF: predicated region fallthrough
CT: control target
= control target key end

     0   :  { %11 = vsyncpa [#allocation3], 0  ;;  %s645_s0 = inlined_call_operand.vmem [shape: bf16[8,16], index: 0, kind: input, shape index: {}]   ;;  %s646_s1 = inlined_call_operand.vmem [shape: s32[8,2], index: 1, kind: input, shape index: {}]   ;;  %s647_s2 = inlined_call_operand.vmem [shape: bf16[16,128], index: 2, kind: input, shape index: {}]   ;;  %s648_s3 = inlined_call_operand.vmem [shape: f32[1,128], index: 3, kind: input, shape index: {}]   ;;  %s649_s4 = inlined_call_operand.hbm [shape: bf16[128,384], index: 4, kind: input, shape index: {}]   ;;  %s650_s5 = inlined_call_operand.vmem [shape: f32[1,384], index: 5, kind: input, shape index: {}]   ;;  %s651_s6 = inlined_call_operand.hbm [shape: bf16[8,384], index: 6, kind: output, shape index: {}]  }
   0x1   :  { %12 = vsyncpa [#allocation4], 0  ;;  %s561_s21 = smov [#allocation2]   ;;  %s513_s25 = scalar_lea.hbm %s649_s4, 3072 }
   0x2   :  { %s26_s22 = sshll.u32 %s561_s21, 4  ;;  %p514_p0 = scmp.ne.s32.totalorder %s649_s4, %s513_s25  ;;  %s27_s22 = int_to_ptr.vmem [resolvable:$true] %s26_s22 }
   0x3   :  { %p517_p1 = scmp.lt.u32.totalorder %s513_s25, %s649_s4 }
   0x5   :  { %p519_p2 = pnand %p517_p1, %p514_p0 }
   0x7   :  { %522 = shalt.err (!%p519_p2)
}
   0x8   :  { %s523_s30 = scalar_lea.vmem %s27_s22, 3072  ;;  %p528_p4 = scmp.lt.s32.totalorder %s27_s22, %s27_s22 }
   0x9   :  { %p524_p3 = scmp.ne.s32.totalorder %s27_s22, %s523_s30  ;;  %p529_p5 = scmp.lt.s32.totalorder %s523_s30, %s523_s30 }
   0xb   :  { %p530_p6 = por %p529_p5, %p528_p4 }
   0xd   :  { %p531_p7 = pnand %p530_p6, %p524_p3 }
   0xf   :  { %534 = shalt.err (!%p531_p7)
}
  0x10   :  { %s562_s7 = smov 192   ;;  %s563_s8 = smov 12  }
  0x11   :  { %32 = dma.hbm_to_vmem [thread:$0]  %s649_s4, 3072, %s27_s22, [#allocation3], %s562_s7, %s562_s7, %s563_s8  }
  0x12   :  { %557 = dma.done.wait [#allocation3], 3072  }
  0x13   :  { %558 = vsyncadd [#allocation3], 4294964224  ;;  %v564_v0 = vmov 0.0   ;;  %vm565_vm0 = vmmov 0   ;;  %v480_v1 = vld [vmem:[%s647_s2] sm:$0xff]   ;;  %vm55_vm1 = vcmask 130048   ;;  %v135_v39 = vlaneseq }
  0x14   :  { %444 = vmatprep.subr.bf16.mxu0 %v564_v0  ;;  %446 = vmatprep.mubr.msk.bf16.mxu0 %vm565_vm0, %v564_v0  ;;  %v39_v2 = vld [vmem:[%s645_s0] sm:$0xf]  ;;  %v481_v3 = vld [vmem:[#allocation2 + $0x4] ss:$12 sps:$4 sm:$0xff]   ;;  %v484_v5 = vld [vmem:[#allocation2 + $0x8] ss:$12 sps:$4 sm:$0xff]  }
  0x15   :  { %445 = vmatpush3.bf16.msra.mxu0 %v480_v1  ;;  %v483_v4 = vld [vmem:[#allocation2] ss:$12 sps:$4 sm:$0xff]   ;;  %278 = vmatprep.subr.bf16.mxu1 %v481_v3  ;;  %v485_v6 = vld [vmem:[#allocation2 + $0x1c] ss:$12 sps:$4 sm:$0xff]   ;;  %v487_v7 = vld [vmem:[#allocation2 + $0x18] ss:$12 sps:$4 sm:$0xff]  }
  0x16   :  { %450 = vmatprep.subr.bf16.mxu0 %v564_v0  ;;  %279 = vmatpush1.bf16.msra.mxu1 %v483_v4  ;;  %v488_v8 = vld [vmem:[#allocation2 + $0x20] ss:$12 sps:$4 sm:$0xff]   ;;  %v491_v10 = vld [vmem:[#allocation2 + $0x30] ss:$12 sps:$4 sm:$0xff]   ;;  %v492_v11 = vld [vmem:[#allocation2 + $0x38] ss:$12 sps:$4 sm:$0xff]  }
  0x17   :  { %280 = vmatprep.subr.bf16.mxu1 %v485_v6  ;;  %v489_v9 = vld [vmem:[#allocation2 + $0x34] ss:$12 sps:$4 sm:$0xff]   ;;  %v493_v12 = vld [vmem:[#allocation2 + $0x4c] ss:$12 sps:$4 sm:$0xff]   ;;  %v496_v14 = vld [vmem:[#allocation2 + $0x50] ss:$12 sps:$4 sm:$0xff]  }
  0x18   :  { %447 = vmatmul.mubr.msk.bf16.vlgmr.msra.gmra.mrb[0].mxu0 %vm55_vm1, %v39_v2  ;;  %v495_v13 = vld [vmem:[#allocation2 + $0x48] ss:$12 sps:$4 sm:$0xff]   ;;  %v497_v15 = vld [vmem:[#allocation2 + $0x64] ss:$12 sps:$4 sm:$0xff]   ;;  %v499_v16 = vld [vmem:[#allocation2 + $0x60] ss:$12 sps:$4 sm:$0xff]  }
  0x19   :  { %451 = vmatpush3.bf16.msra.mxu0 %v484_v5  ;;  %466 = vmatprep.mubr.msk.bf16.mxu0 %vm565_vm0, %v564_v0  ;;  %v500_v17 = vld [vmem:[#allocation2 + $0x68] ss:$12 sps:$4 sm:$0xff]   ;;  %v503_v19 = vld [vmem:[#allocation2 + $0x78] ss:$12 sps:$4 sm:$0xff]   ;;  %v504_v20 = vld [vmem:[#allocation2 + $0x80] ss:$12 sps:$4 sm:$0xff]  }
  0x1a   :  { %452 = vmatprep.subr.bf16.mxu0 %v564_v0  ;;  %281 = vmatpush1.bf16.msra.mxu1 %v487_v7  ;;  %v501_v18 = vld [vmem:[#allocation2 + $0x7c] ss:$12 sps:$4 sm:$0xff]   ;;  %v505_v21 = vld [vmem:[#allocation2 + $0x94] ss:$12 sps:$4 sm:$0xff]   ;;  %v508_v23 = vld [vmem:[#allocation2 + $0x98] ss:$12 sps:$4 sm:$0xff]  }
  0x1b   :  { %282 = vmatprep.subr.bf16.mxu1 %v489_v9  ;;  %v507_v22 = vld [vmem:[#allocation2 + $0x90] ss:$12 sps:$4 sm:$0xff]   ;;  %v509_v24 = vld [vmem:[#allocation2 + $0xac] ss:$12 sps:$4 sm:$0xff]   ;;  %v511_v25 = vld [vmem:[#allocation2 + $0xa8] ss:$12 sps:$4 sm:$0xff]  }
  0x1c   :  { %v512_v26 = vld [vmem:[#allocation2 + $0xb0] ss:$12 sps:$4 sm:$0xff]   ;;  %v566_v27 = vmov 0   ;;  %v359_v28 = vld [vmem:[%s646_s1] sm:$0xff]  ;;  %v567_v30 = vmov 1   ;;  %v136_v40 = vshrl.u32 %v135_v39, 7 }
  0x1d   :  { %453 = vmatpush3.bf16.msra.mxu0 %v488_v8  ;;  %310 = vmatprep.mubr.bf16.mxu1 %v566_v27  ;;  %vm360_vm2 = vcmp.eq.s32.totalorder %v359_v28, 1  ;;  %v402_v31 = vld [vmem:[%s648_s3] ss:$0 sm:$0xff]  ;;  %s568_s3 = smov [#allocation5]  }
  0x1e   :  { %454 = vmatprep.subr.bf16.mxu0 %v564_v0  ;;  %283 = vmatpush1.bf16.msra.mxu1 %v491_v10  ;;  %v361_v29 = vsel %vm360_vm2, 1, %v566_v27  ;;  %v145_v42 = vsub.s32 2, %v136_v40  ;;  %v133_v43 = vld [vmem:[%s650_s5] sm:$0x7]  ;;  %v141_v44 = vsub.s32 1, %v136_v40  ;;  %v137_v45 = vsub.s32 0, %v136_v40 }
  0x1f   :  { %284 = vmatprep.subr.bf16.mxu1 %v493_v12  ;;  %478 = vset.pattern.permute.xlu0 %v566_v27  ;;  %s393_s17 = sshll.u32 %s568_s3, 4  ;;  %s394_s17 = int_to_ptr.vmem [resolvable:$true] %s393_s17 }
  0x20   :  { %363 = vperm.xlu0 %478, %v361_v29   ;;  %v146_v46 = vrot.slane %v133_v43, %v145_v42  ;;  %v142_v47 = vrot.slane %v133_v43, %v141_v44  ;;  %v138_v49 = vrot.slane %v133_v43, %v137_v45  ;;  %s535_s5 = scalar_lea.vmem %s394_s17, 192  ;;  %p540_p9 = scmp.lt.s32.totalorder %s394_s17, %s394_s17 }
  0x21   :  { %455 = vmatpush3.bf16.msra.mxu0 %v492_v11  ;;  %p536_p8 = scmp.ne.s32.totalorder %s394_s17, %s535_s5  ;;  %p541_p10 = scmp.lt.s32.totalorder %s535_s5, %s535_s5 }
  0x22   :  { %456 = vmatprep.subr.bf16.mxu0 %v564_v0  ;;  %285 = vmatpush1.bf16.msra.mxu1 %v495_v13 }
  0x23   :  { %286 = vmatprep.subr.bf16.mxu1 %v497_v15  ;;  %p542_p11 = por %p541_p10, %p540_p9 }
  0x24   :  { %479 = vset.pattern.permute.xlu0 %v567_v30 }
  0x25   :  { %457 = vmatpush3.bf16.msra.mxu0 %v496_v14  ;;  %368 = vperm.xlu0 %479, %v361_v29   ;;  %p543_p12 = pnand %p542_p11, %p536_p8 }
  0x26   :  { %458 = vmatprep.subr.bf16.mxu0 %v564_v0  ;;  %287 = vmatpush1.bf16.msra.mxu1 %v499_v16 }
  0x27   :  { %288 = vmatprep.subr.bf16.mxu1 %v501_v18 }
  0x29   :  { %459 = vmatpush3.bf16.msra.mxu0 %v500_v17 }
  0x2a   :  { %460 = vmatprep.subr.bf16.mxu0 %v564_v0  ;;  %289 = vmatpush1.bf16.msra.mxu1 %v503_v19 }
  0x2b   :  { %290 = vmatprep.subr.bf16.mxu1 %v505_v21 }
  0x2d   :  { %461 = vmatpush3.bf16.msra.mxu0 %v504_v20 }
  0x2e   :  { %462 = vmatprep.subr.bf16.mxu0 %v564_v0  ;;  %291 = vmatpush1.bf16.msra.mxu1 %v507_v22 }
  0x2f   :  { %292 = vmatprep.subr.bf16.mxu1 %v509_v24 }
  0x31   :  { %463 = vmatpush3.bf16.msra.mxu0 %v508_v23 }
  0x32   :  { %464 = vmatprep.subr.bf16.mxu0 %v564_v0  ;;  %293 = vmatpush1.bf16.msra.mxu1 %v511_v25 }
  0x35   :  { %465 = vmatpush3.bf16.msra.mxu0 %v512_v26 }
  0x9f   :  { %v364_v41 = vpop.permute.xlu0 %363 }
  0xa0   :  { %vm365_vm4 = vcmp.eq.s32.totalorder %v364_v41, 1 }
  0xa4   :  { %v369_v48 = vpop.permute.xlu0 %368 }
  0xa5   :  { %vm370_vm3 = vcmp.eq.s32.totalorder %v369_v48, 1 }
  0xeb   :  { %v93_v32 = vpop.f32.mrb[0].mxu0 }
  0xec   :  { %v94_v33 = vadd.f32 %v402_v31, %v93_v32  ;;  %v448_v34 = vpop.f32.mrb[1].mxu0 }
  0xed   :  { %v96_v35 = vpop.f32.mrb[2].mxu0 }
  0xee   :  { %v99_v36 = vmax.f32 %v94_v33, 0.0  ;;  %v449_v37 = vpop.f32.mrb[3].mxu0 }
  0xf0   :  { %v100_v38 = vpack.c.bf16 %v99_v36, %v99_v36 }
  0xf2   :  { %311 = vmatmul.mubr.bf16.vlgmr.msra.gmra.mrb[0].mxu1 %v100_v38  ;;  %467 = vmatmul.mubr.bf16.vlgmr.msra.gmra.mrb[4].mxu0 %v100_v38 }
 0x1c5   :  { %v312_v50 = vpop.f32.mrb[0].mxu1  ;;  %v353_v51 = vpop.f32.mrb[4].mxu0 }
 0x1c6   :  { %v354_v52 = vadd.f32 %v353_v51, %v146_v46  ;;  %v314_v53 = vpop.f32.mrb[1].mxu1  ;;  %v468_v54 = vpop.f32.mrb[5].mxu0  ;;  %v313_v58 = vadd.f32 %v312_v50, %v138_v49 }
 0x1c7   :  { %v315_v55 = vadd.f32 %v314_v53, %v142_v47  ;;  %v316_v56 = vpop.f32.mrb[2].mxu1  ;;  %v356_v57 = vpop.f32.mrb[6].mxu0 }
 0x1c8   :  { %v317_v59 = vpop.f32.mrb[3].mxu1  ;;  %v469_v60 = vpop.f32.mrb[7].mxu0 }
 0x1c9   :  { %v366_v61 = vsel %vm365_vm4, %v354_v52, %v315_v55  ;;  %v371_v62 = vsel %vm370_vm3, %v354_v52, %v315_v55 }
 0x1ca   :  { %v432_v63 = vpack.c.bf16 %v371_v62, %v371_v62  ;;  %v431_v0 = vpack.c.bf16 %v366_v61, %v313_v58 }
 0x1cc   :  { %386 = vst [vmem:[#allocation5 + $0x8] sm:$0xf] %v432_v63  ;;  %385 = vst [vmem:[#allocation5] sm:$0xff] %v431_v0 }
 0x1cd   :  { %546 = shalt.err (!%p543_p12)
}
 0x1ce   :  { %s547_s20 = scalar_lea.hbm %s651_s6, 192 }
 0x1cf   :  { %p548_p13 = scmp.ne.s32.totalorder %s651_s6, %s547_s20  ;;  %p551_p0 = scmp.lt.u32.totalorder %s547_s20, %s651_s6 }
 0x1d1   :  { %p553_p1 = pnand %p551_p0, %p548_p13 }
 0x1d3   :  { %556 = shalt.err (!%p553_p1)
}
 0x1d4   :  { %396 = dma.vmem_to_hbm [thread:$0]  %s394_s17, 192, %s651_s6, [#allocation4]  }
 0x1d5   :  { %559 = dma.done.wait [#allocation4], 192  }
 0x1d6   :  { %560 = vsyncadd [#allocation4], 4294967104 }
 0x1d7   :  { %400 = vsyncpa [#allocation3], 1 }
 0x1d8   :  { %401 = vsyncpa [#allocation4], 1 }

</bundles_post_ra>
